<compile_context>
chip_gen: v5e
topology: v5e:2x2
jax: 0.10.0
libtpu: 0.0.40
codegen_flags: <defaults>
</compile_context>

<pallas_src>
import jax
import jax.numpy as jnp
from jax.experimental import pallas as pl
from jax.experimental.pallas import tpu as pltpu


def _relu_kernel(x_ref, o_ref):
    # Elementwise ReLU on the current VMEM tile (pure VPU work, HBM-bound).
    o_ref[...] = jnp.maximum(x_ref[...], jnp.zeros((), dtype=x_ref.dtype))


# Widest lane dimension we will try (multiple of 128), and target tile bytes.
_COL_CANDIDATES = (32768, 16384, 8192, 4096, 2048, 1024, 512, 256, 128)
_TARGET_TILE_BYTES = 4 * 1024 * 1024   # ~4 MiB/tile -> 4 double-buffered bufs ~16 MiB
_VMEM_LIMIT_BYTES = 32 * 1024 * 1024


def _sublane_multiple(itemsize: int) -> int:
    # Native packed sublane tile: f32 -> 8, bf16 -> 16, int8/fp8 -> 32.
    return max(8, 32 // itemsize)


def _relu_pallas(x, grid, block_shape, index_map, n_elems, itemsize):
    return pl.pallas_call(
        _relu_kernel,
        out_shape=jax.ShapeDtypeStruct(x.shape, x.dtype),
        grid_spec=pltpu.PrefetchScalarGridSpec(
            num_scalar_prefetch=0,
            grid=grid,
            in_specs=[pl.BlockSpec(block_shape, index_map)],
            out_specs=pl.BlockSpec(block_shape, index_map),
        ),
        # ReLU is safe in-place: reuse the input HBM buffer for the output.
        input_output_aliases={0: 0},
        cost_estimate=pl.CostEstimate(
            flops=n_elems,
            transcendentals=0,
            bytes_accessed=2 * n_elems * itemsize,
        ),
        compiler_params=pltpu.CompilerParams(
            dimension_semantics=("parallel",),
            vmem_limit_bytes=_VMEM_LIMIT_BYTES,
        ),
    )(x)


def q_relu(x: jax.Array) -> jax.Array:
    """Pallas implementation of Q_ReLU.forward (full_fp path == F.relu)."""
    orig_shape = x.shape
    n = x.size
    if n == 0:
        return x

    itemsize = jnp.dtype(x.dtype).itemsize
    sub = _sublane_multiple(itemsize)
    flat = x.reshape(-1)

    if n % 128 == 0:
        # Lane-dense 2D layout: cols is the widest multiple of 128 dividing n.
        cols = next(c for c in _COL_CANDIDATES if n % c == 0)
        rows = n // cols
        x2d = flat.reshape(rows, cols)

        if rows <= 2 * sub:
            # Tiny array: single full-extent block (always legal).
            tile_rows = rows
        else:
            # ~4 MiB tiles, rounded to the dtype's packed sublane multiple.
            tile_rows = max(sub, (_TARGET_TILE_BYTES // (cols * itemsize)) // sub * sub)
            # Cap so the grid has >= 2 steps (shardable across v7x's 2 TCs).
            half_aligned = pl.cdiv(pl.cdiv(rows, 2), sub) * sub
            tile_rows = min(tile_rows, half_aligned)

        grid = (pl.cdiv(rows, tile_rows),)
        out = _relu_pallas(x2d, grid, (tile_rows, cols), lambda i: (i, 0),
                           n, itemsize)
        return out.reshape(orig_shape)

    # n not a multiple of 128: run directly on the flat 1D array.  Blocks are
    # multiples of 1024 (= 8*128) elements, so only the trailing block is
    # masked — no pad + slice extra HBM passes.
    if n < 2 * 1024:
        tile = n                      # single full-extent block (always legal)
    else:
        tile = max(1024, (_TARGET_TILE_BYTES // itemsize) // 1024 * 1024)
        half_aligned = pl.cdiv(pl.cdiv(n, 2), 1024) * 1024
        tile = min(tile, half_aligned)   # guarantees >= 2 grid steps

    grid = (pl.cdiv(n, tile),)
    out = _relu_pallas(flat, grid, (tile,), lambda i: (i,), n, itemsize)
    return out.reshape(orig_shape)


if __name__ == "__main__":
    key = jax.random.PRNGKey(0)

    # NCHW input, consistent with the conv-net context of the module.
    x = jax.random.normal(key, (2, 4, 16, 16), dtype=jnp.float32)
    y = q_relu(x)
    jax.block_until_ready(y)
    y_ref = jnp.maximum(x, 0.0)
    assert y.shape == x.shape and y.dtype == x.dtype
    assert bool(jnp.allclose(y, y_ref))

    # Also exercise the non-multiple-of-128 (flat 1D, un-padded) path.
    x2 = jax.random.normal(jax.random.PRNGKey(1), (2, 3, 7, 7), dtype=jnp.float32)
    y2 = q_relu(x2)
    jax.block_until_ready(y2)
    assert y2.shape == x2.shape and y2.dtype == x2.dtype
    assert bool(jnp.allclose(y2, jnp.maximum(x2, 0.0)))

    print("KERNEL_OK")
</pallas_src>

<mosaic_0001>
module attributes {stable_mosaic.version = 11 : i64} {
  func.func @_relu_kernel(%arg0: i32, %arg1: memref<1x2048xf32, #tpu.memory_space<vmem>>, %arg2: memref<1x2048xf32, #tpu.memory_space<vmem>>) attributes {dimension_semantics = [#tpu.dimension_semantics<parallel>], iteration_bounds = array<i64: 1>, scalar_prefetch = 0 : i64, scratch_operands = 0 : i64, tpu.core_type = #tpu.core_type<tc>, window_params = [{transform_indices = @transform_0, window_bounds = array<i64: 1, 2048>}, {transform_indices = @transform_1, window_bounds = array<i64: 1, 2048>}]} {
    %c0 = arith.constant 0 : index
    %c0_0 = arith.constant 0 : index
    %0 = vector.load %arg1[%c0, %c0_0] : memref<1x2048xf32, #tpu.memory_space<vmem>>, vector<1x2048xf32>
    %cst = arith.constant 0.000000e+00 : f32
    %1 = vector.broadcast %cst : f32 to vector<1x2048xf32>
    %2 = arith.maximumf %0, %1 : vector<1x2048xf32>
    %c0_1 = arith.constant 0 : index
    %c0_2 = arith.constant 0 : index
    %3 = vector.load %arg2[%c0_1, %c0_2] : memref<1x2048xf32, #tpu.memory_space<vmem>>, vector<1x2048xf32>
    tpu.vector_store %arg2[%c0_1, %c0_2], %2 {strides = array<i32>} : memref<1x2048xf32, #tpu.memory_space<vmem>>, vector<1x2048xf32>,
    return
  }
  func.func @transform_0(%arg0: i32) -> (i32, i32) {
    %c0_i32 = arith.constant 0 : i32
    %c0_i32_0 = arith.constant 0 : i32
    return %arg0, %c0_i32 : i32, i32
  }
  func.func @transform_1(%arg0: i32) -> (i32, i32) {
    %c0_i32 = arith.constant 0 : i32
    %c0_i32_0 = arith.constant 0 : i32
    return %arg0, %c0_i32 : i32, i32
  }
}

</mosaic_0001>

<bundles_post_ra>
// kernel: tpu_custom_call.1
= control target key start
LH: loop header
LB: loop body
LE: loop exit
PB: predicated region body
PF: predicated region fallthrough
CT: control target
= control target key end

     0   :  { %6 = vsyncpa [#allocation3], 0  ;;  %s118_s0 = inlined_call_operand.hbm [shape: f32[1,2048], index: 0, kind: input, shape index: {}, may-alias: {0,1}]   ;;  %s119_s1 = inlined_call_operand.hbm [shape: f32[1,2048], index: 1, kind: output, shape index: {}, may-alias: {0,1}]  }
   0x1   :  { %7 = vsyncpa [#allocation4], 0  ;;  %s13_s8 = sshll.u32 %s118_s0, 4  ;;  %s100_s9 = smov [#allocation2]   ;;  %s14_s8 = int_to_ptr.hbm [resolvable:$true] %s13_s8 }
   0x2   :  { %s15_s10 = sshll.u32 %s100_s9, 4  ;;  %s16_s10 = int_to_ptr.vmem [resolvable:$true] %s15_s10 }
   0x3   :  { %18 = dma.hbm_to_vmem [thread:$0]  %s14_s8, 256, %s16_s10, [#allocation3]  }
   0x4   :  { %96 = dma.done.wait [#allocation3], 256  }
   0x5   :  { %97 = vsyncadd [#allocation3], 4294967040  ;;  %s101_s11 = smov [#allocation5]   ;;  %s36_s15 = sshll.u32 %s119_s1, 4  ;;  %v23_v0 = vld [vmem:[#allocation2] sm:$0xff]  ;;  %v24_v1 = vld [vmem:[#allocation2 + $0x8] sm:$0xff]  ;;  %s37_s15 = int_to_ptr.hbm [resolvable:$true] %s36_s15 }
   0x6   :  { %s34_s12 = sshll.u32 %s101_s11, 4  ;;  %v25_v2 = vmax.f32 %v23_v0, 0.0  ;;  %v26_v3 = vmax.f32 %v24_v1, 0.0  ;;  %s35_s12 = int_to_ptr.vmem [resolvable:$true] %s34_s12 }
   0x8   :  { %27 = vst [vmem:[#allocation5] sm:$0xff] %v25_v2 }
   0x9   :  { %28 = vst [vmem:[#allocation5 + $0x8] sm:$0xff] %v26_v3 }
   0xa   :  { %39 = dma.vmem_to_hbm [thread:$0]  %s35_s12, 256, %s37_s15, [#allocation4]  }
   0xb   :  { %98 = dma.done.wait [#allocation4], 256  }
   0xc   :  { %99 = vsyncadd [#allocation4], 4294967040 }
   0xd   :  { %44 = vsyncpa [#allocation3], 1 }
   0xe   :  { %45 = vsyncpa [#allocation4], 1 }

</bundles_post_ra>
